<compile_context>
chip_gen: v7x
topology: tpu7x:2x2x1
jax: 0.10.0
libtpu: 0.0.40
codegen_flags: <defaults>
</compile_context>

<pallas_src>
import functools

import jax
import jax.numpy as jnp
from jax.experimental import pallas as pl
from jax.experimental.pallas import tpu as pltpu


def attention_kernel(z_ref, w1_ref, b1_ref, w2_ref, exp_ref, sumpad_ref,
                     bsel_ref, y_ref, *, h_bf16, approx_softmax):
    # z_ref      : (TN, M*D)   flattened views, lane-dense      (f32 or bf16)
    # w1_ref     : (M*D, M*H)  block-diagonal first projection  (f32 or bf16)
    # b1_ref     : (1,   M*H)  per-view-tiled bias              (f32)
    # w2_ref     : (M*H, M)    block-diagonal second projection (f32 or bf16)
    # exp_ref    : (M,   M*D)  beta -> per-feature expansion (0/1 matrix)
    # sumpad_ref : (M*D, D+M)  [view-sum reduction | 0]
    # bsel_ref   : (M,   D+M)  [0 | eye(M)]  (places beta in the merged block)
    # y_ref      : (TN,  D+M)  merged output: [:, :D] = out, [:, D:] = beta
    z = z_ref[...]                                                      # (TN, MD)

    # Linear(D->H) + bias + Tanh for all M views at once (no reshapes of z).
    h = jnp.dot(z, w1_ref[...], preferred_element_type=jnp.float32) + b1_ref[...]
    if h_bf16:
        h = h.astype(jnp.bfloat16)       # v6e/v7x: bf16 EUP halves tanh cost
    h = jnp.tanh(h)                                                     # (TN, MH)

    # Linear(H->1, no bias) per view -> scores laid out directly as (TN, M).
    w = jnp.dot(h, w2_ref[...], preferred_element_type=jnp.float32)     # (TN, M)

    # Softmax over the views axis (PyTorch dim=1), numerically stable.
    w_max = jnp.max(w, axis=1, keepdims=True)
    e = jnp.exp(w - w_max)
    denom = jnp.sum(e, axis=1, keepdims=True)
    if approx_softmax:
        beta = e * pl.reciprocal(denom, approx=True)
    else:
        beta = e / denom                                                # (TN, M)

    # out[n, d] = sum_m beta[n, m] * z[n, m, d] without 3-D broadcasting:
    # expand beta over D via a 0/1 matmul, multiply elementwise on the dense
    # (TN, MD) slab, reduce over views with a zero-padded 0/1 matmul, and place
    # beta into the trailing M columns of the same merged block with one more
    # tiny matmul + add -> a single store stream / single write-back DMA.
    beta_exp = jnp.dot(beta, exp_ref[...], preferred_element_type=jnp.float32)   # (TN, MD)
    zf = z.astype(jnp.float32)
    y = jnp.dot(beta_exp * zf, sumpad_ref[...], preferred_element_type=jnp.float32)
    y = y + jnp.dot(beta, bsel_ref[...], preferred_element_type=jnp.float32)
    y_ref[...] = y                                                      # (TN, D+M)


def _round_up(x, m):
    return ((x + m - 1) // m) * m


@functools.partial(
    jax.jit,
    static_argnames=("tile_n", "z_bf16", "h_bf16", "approx_softmax",
                     "z_buffers", "vmem_limit_bytes"))
def attention_forward(z, w1, b1, w2, *, tile_n=2048, z_bf16=False, h_bf16=False,
                      approx_softmax=False, z_buffers=None,
                      vmem_limit_bytes=None):
    """z: (N, M, D); w1: (D, H); b1: (H,); w2: (H, 1).
    Returns (out (N, D) f32, beta (N, M, 1) f32)."""
    N, M, D = z.shape
    H = w1.shape[1]
    MD, MH, DPM = M * D, M * H, D + M

    f32 = jnp.float32
    in_dt = jnp.bfloat16 if z_bf16 else f32   # z stream / first-matmul weights
    h_dt = jnp.bfloat16 if h_bf16 else f32    # tanh slab / second-matmul weights

    # Flatten views into lanes: free reshape (row-major contiguous).
    z_flat = z.reshape(N, MD).astype(in_dt)

    # Clamp the tile: 8-aligned, and capped at half the (8-aligned) row count so
    # the grid has >= 2 steps whenever possible (v7x 2-TC sharding via
    # dimension_semantics=("parallel",)).  Then pad N up to a tile multiple;
    # padded rows are zeros, fully row-independent, and sliced away.
    n8 = _round_up(N, 8)
    half = _round_up((n8 + 1) // 2, 8)
    tn = max(8, min(_round_up(int(tile_n), 8), half))
    n_pad = _round_up(N, tn)
    if n_pad != N:
        z_flat = jnp.pad(z_flat, ((0, n_pad - N), (0, 0)))

    # Constant projection/reduction matrices (tiny, built once per compile).
    eye_m = jnp.eye(M, dtype=f32)
    w1_blk = jnp.kron(eye_m, w1.astype(f32)).astype(in_dt)               # (MD, MH)
    b1_blk = jnp.tile(b1.astype(f32).reshape(1, H), (1, M))              # (1,  MH)
    w2_blk = jnp.kron(eye_m, w2.astype(f32)).astype(h_dt)                # (MH, M)
    expand = jnp.kron(eye_m, jnp.ones((1, D), f32))                      # (M,  MD)
    viewsum = jnp.kron(jnp.ones((M, 1), f32), jnp.eye(D, dtype=f32))     # (MD, D)
    sum_pad = jnp.concatenate([viewsum, jnp.zeros((MD, M), f32)], axis=1)  # (MD, D+M)
    beta_sel = jnp.concatenate([jnp.zeros((M, D), f32), eye_m], axis=1)    # (M,  D+M)

    if z_buffers is None:
        z_spec = pl.BlockSpec((tn, MD), lambda i: (i, 0))
    else:
        # v5e knob: try 3 only after a trace shows the z DMA exposed.
        z_spec = pl.BlockSpec((tn, MD), lambda i: (i, 0),
                              pipeline_mode=pl.Buffered(int(z_buffers)))

    cp = dict(dimension_semantics=("parallel",))
    if vmem_limit_bytes is not None:
        cp["vmem_limit_bytes"] = int(vmem_limit_bytes)

    z_bytes = 2 if z_bf16 else 4
    cost = pl.CostEstimate(
        flops=2 * n_pad * (MD * MH + MH * M + M * MD + MD * DPM + M * DPM),
        transcendentals=n_pad * (MH + M),
        bytes_accessed=(z_bytes * n_pad * MD + 4 * n_pad * DPM
                        + 4 * (MD * MH + MH + MH * M + M * MD
                               + MD * DPM + M * DPM)),
    )

    kernel = functools.partial(attention_kernel, h_bf16=h_bf16,
                               approx_softmax=approx_softmax)

    y = pl.pallas_call(
        kernel,
        out_shape=jax.ShapeDtypeStruct((n_pad, DPM), f32),
        grid_spec=pltpu.PrefetchScalarGridSpec(
            num_scalar_prefetch=0,
            grid=(n_pad // tn,),
            in_specs=[
                z_spec,
                pl.BlockSpec((MD, MH), lambda i: (0, 0)),
                pl.BlockSpec((1, MH), lambda i: (0, 0)),
                pl.BlockSpec((MH, M), lambda i: (0, 0)),
                pl.BlockSpec((M, MD), lambda i: (0, 0)),
                pl.BlockSpec((MD, DPM), lambda i: (0, 0)),
                pl.BlockSpec((M, DPM), lambda i: (0, 0)),
            ],
            out_specs=pl.BlockSpec((tn, DPM), lambda i: (i, 0)),
        ),
        compiler_params=pltpu.CompilerParams(**cp),
        cost_estimate=cost,
    )(z_flat, w1_blk, b1_blk, w2_blk, expand, sum_pad, beta_sel)

    out = y[:N, :D]
    beta = y[:N, D:].reshape(N, M, 1)   # PyTorch returns beta as (N, M, 1)
    return out, beta


def _reference(z, w1, b1, w2):
    hp = jax.lax.Precision.HIGHEST
    h = jnp.tanh(jnp.einsum("nmd,dh->nmh", z, w1, precision=hp) + b1)
    w = jnp.einsum("nmh,ho->nmo", h, w2, precision=hp)       # (N, M, 1)
    beta = jax.nn.softmax(w, axis=1)
    return (beta * z).sum(axis=1), beta


def _make_inputs(key, N, M, D, H):
    kz, kw1, kb1, kw2 = jax.random.split(key, 4)
    z = jax.random.normal(kz, (N, M, D), dtype=jnp.float32)
    lim1 = 1.0 / (D ** 0.5)
    lim2 = 1.0 / (H ** 0.5)
    w1 = jax.random.uniform(kw1, (D, H), jnp.float32, -lim1, lim1)
    b1 = jax.random.uniform(kb1, (H,), jnp.float32, -lim1, lim1)
    w2 = jax.random.uniform(kw2, (H, 1), jnp.float32, -lim2, lim2)
    return z, w1, b1, w2


if __name__ == "__main__":
    key = jax.random.PRNGKey(0)
    k1, k2 = jax.random.split(key)

    # Exact-softmax f32 path: tolerances tightened vs. previous version.
    ATOL = RTOL = 2e-3

    # Test 1: small shapes matching the module (M=4 fused views, in=16, hidden=32).
    N, M, D, H = 16, 4, 16, 32
    z, w1, b1, w2 = _make_inputs(k1, N, M, D, H)
    out, beta = attention_forward(z, w1, b1, w2)
    jax.block_until_ready((out, beta))
    out_ref, beta_ref = _reference(z, w1, b1, w2)
    assert jnp.allclose(out, out_ref, atol=ATOL, rtol=RTOL), \
        float(jnp.max(jnp.abs(out - out_ref)))
    assert jnp.allclose(beta, beta_ref, atol=ATOL, rtol=RTOL), \
        float(jnp.max(jnp.abs(beta - beta_ref)))

    # Test 2: ragged N + multi-step grid (exercises padding and tiling paths).
    N2 = 1003
    z2, w1b, b1b, w2b = _make_inputs(k2, N2, M, D, H)
    out2, beta2 = attention_forward(z2, w1b, b1b, w2b, tile_n=256)
    jax.block_until_ready((out2, beta2))
    out2_ref, beta2_ref = _reference(z2, w1b, b1b, w2b)
    assert jnp.allclose(out2, out2_ref, atol=ATOL, rtol=RTOL), \
        float(jnp.max(jnp.abs(out2 - out2_ref)))
    assert jnp.allclose(beta2, beta2_ref, atol=ATOL, rtol=RTOL), \
        float(jnp.max(jnp.abs(beta2 - beta2_ref)))

    # Test 3: bf16 fast path (bf16 z stream + bf16 tanh slab), looser tolerance.
    out3, beta3 = attention_forward(z2, w1b, b1b, w2b, tile_n=256,
                                    z_bf16=True, h_bf16=True)
    jax.block_until_ready((out3, beta3))
    assert jnp.allclose(out3, out2_ref, atol=5e-2, rtol=5e-2), \
        float(jnp.max(jnp.abs(out3 - out2_ref)))
    assert jnp.allclose(beta3, beta2_ref, atol=5e-2, rtol=5e-2), \
        float(jnp.max(jnp.abs(beta3 - beta2_ref)))

    print("KERNEL_OK")
</pallas_src>

<mosaic_0001>
module attributes {stable_mosaic.version = 11 : i64} {
  func.func @attention_kernel(%arg0: i32, %arg1: memref<8x64xf32, #tpu.memory_space<vmem>>, %arg2: memref<64x128xf32, #tpu.memory_space<vmem>>, %arg3: memref<1x128xf32, #tpu.memory_space<vmem>>, %arg4: memref<128x4xf32, #tpu.memory_space<vmem>>, %arg5: memref<4x64xf32, #tpu.memory_space<vmem>>, %arg6: memref<64x20xf32, #tpu.memory_space<vmem>>, %arg7: memref<4x20xf32, #tpu.memory_space<vmem>>, %arg8: memref<8x20xf32, #tpu.memory_space<vmem>>) attributes {dimension_semantics = [#tpu.dimension_semantics<parallel>], iteration_bounds = array<i64: 2>, scalar_prefetch = 0 : i64, scratch_operands = 0 : i64, tpu.core_type = #tpu.core_type<tc>, window_params = [{transform_indices = @transform_0, window_bounds = array<i64: 8, 64>}, {pipeline_mode = #tpu.pipeline_mode<synchronous>, transform_indices = @transform_1, window_bounds = array<i64: 64, 128>}, {pipeline_mode = #tpu.pipeline_mode<synchronous>, transform_indices = @transform_2, window_bounds = array<i64: 1, 128>}, {pipeline_mode = #tpu.pipeline_mode<synchronous>, transform_indices = @transform_3, window_bounds = array<i64: 128, 4>}, {pipeline_mode = #tpu.pipeline_mode<synchronous>, transform_indices = @transform_4, window_bounds = array<i64: 4, 64>}, {pipeline_mode = #tpu.pipeline_mode<synchronous>, transform_indices = @transform_5, window_bounds = array<i64: 64, 20>}, {pipeline_mode = #tpu.pipeline_mode<synchronous>, transform_indices = @transform_6, window_bounds = array<i64: 4, 20>}, {transform_indices = @transform_7, window_bounds = array<i64: 8, 20>}]} {
    %c0 = arith.constant 0 : index
    %c0_0 = arith.constant 0 : index
    %0 = vector.load %arg1[%c0, %c0_0] : memref<8x64xf32, #tpu.memory_space<vmem>>, vector<8x64xf32>
    %c0_1 = arith.constant 0 : index
    %c0_2 = arith.constant 0 : index
    %1 = vector.load %arg2[%c0_1, %c0_2] : memref<64x128xf32, #tpu.memory_space<vmem>>, vector<64x128xf32>
    %cst = arith.constant dense<0.000000e+00> : vector<8x128xf32>
    %2 = tpu.matmul %0, %1, %cst {dimension_numbers = #tpu.dot_dimension_numbers<[1], [0], [0], [1], [0, 0, 1, 1], [], []>} : vector<8x64xf32>, vector<64x128xf32>, vector<8x128xf32> -> vector<8x128xf32>
    %c0_3 = arith.constant 0 : index
    %c0_4 = arith.constant 0 : index
    %3 = vector.load %arg3[%c0_3, %c0_4] : memref<1x128xf32, #tpu.memory_space<vmem>>, vector<1x128xf32>
    %4 = vector.broadcast %3 : vector<1x128xf32> to vector<8x128xf32>
    %5 = arith.addf %2, %4 : vector<8x128xf32>
    %6 = math.tanh %5 : vector<8x128xf32>
    %c0_5 = arith.constant 0 : index
    %c0_6 = arith.constant 0 : index
    %7 = vector.load %arg4[%c0_5, %c0_6] : memref<128x4xf32, #tpu.memory_space<vmem>>, vector<128x4xf32>
    %cst_7 = arith.constant dense<0.000000e+00> : vector<8x4xf32>
    %8 = tpu.matmul %6, %7, %cst_7 {dimension_numbers = #tpu.dot_dimension_numbers<[1], [0], [0], [1], [0, 0, 1, 1], [], []>} : vector<8x128xf32>, vector<128x4xf32>, vector<8x4xf32> -> vector<8x4xf32>
    %cst_8 = arith.constant dense<0xFF800000> : vector<8xf32>
    %9 = vector.multi_reduction <maximumf>, %8, %cst_8 [1] : vector<8x4xf32> to vector<8xf32>
    %10 = vector.shape_cast %9 : vector<8xf32> to vector<8x1xf32>
    %11 = vector.broadcast %10 : vector<8x1xf32> to vector<8x4xf32>
    %12 = arith.subf %8, %11 : vector<8x4xf32>
    %13 = math.exp %12 : vector<8x4xf32>
    %cst_9 = arith.constant dense<0.000000e+00> : vector<8xf32>
    %14 = vector.multi_reduction <add>, %13, %cst_9 [1] : vector<8x4xf32> to vector<8xf32>
    %15 = vector.shape_cast %14 : vector<8xf32> to vector<8x1xf32>
    %16 = vector.broadcast %15 : vector<8x1xf32> to vector<8x4xf32>
    %17 = arith.divf %13, %16 : vector<8x4xf32>
    %c0_10 = arith.constant 0 : index
    %c0_11 = arith.constant 0 : index
    %18 = vector.load %arg5[%c0_10, %c0_11] : memref<4x64xf32, #tpu.memory_space<vmem>>, vector<4x64xf32>
    %cst_12 = arith.constant dense<0.000000e+00> : vector<8x64xf32>
    %19 = tpu.matmul %17, %18, %cst_12 {dimension_numbers = #tpu.dot_dimension_numbers<[1], [0], [0], [1], [0, 0, 1, 1], [], []>} : vector<8x4xf32>, vector<4x64xf32>, vector<8x64xf32> -> vector<8x64xf32>
    %20 = arith.mulf %19, %0 : vector<8x64xf32>
    %c0_13 = arith.constant 0 : index
    %c0_14 = arith.constant 0 : index
    %21 = vector.load %arg6[%c0_13, %c0_14] : memref<64x20xf32, #tpu.memory_space<vmem>>, vector<64x20xf32>
    %cst_15 = arith.constant dense<0.000000e+00> : vector<8x20xf32>
    %22 = tpu.matmul %20, %21, %cst_15 {dimension_numbers = #tpu.dot_dimension_numbers<[1], [0], [0], [1], [0, 0, 1, 1], [], []>} : vector<8x64xf32>, vector<64x20xf32>, vector<8x20xf32> -> vector<8x20xf32>
    %c0_16 = arith.constant 0 : index
    %c0_17 = arith.constant 0 : index
    %23 = vector.load %arg7[%c0_16, %c0_17] : memref<4x20xf32, #tpu.memory_space<vmem>>, vector<4x20xf32>
    %cst_18 = arith.constant dense<0.000000e+00> : vector<8x20xf32>
    %24 = tpu.matmul %17, %23, %cst_18 {dimension_numbers = #tpu.dot_dimension_numbers<[1], [0], [0], [1], [0, 0, 1, 1], [], []>} : vector<8x4xf32>, vector<4x20xf32>, vector<8x20xf32> -> vector<8x20xf32>
    %25 = arith.addf %22, %24 : vector<8x20xf32>
    %c0_19 = arith.constant 0 : index
    %c0_20 = arith.constant 0 : index
    %26 = vector.load %arg8[%c0_19, %c0_20] : memref<8x20xf32, #tpu.memory_space<vmem>>, vector<8x20xf32>
    tpu.vector_store %arg8[%c0_19, %c0_20], %25 {strides = array<i32>} : memref<8x20xf32, #tpu.memory_space<vmem>>, vector<8x20xf32>,
    return
  }
  func.func @transform_0(%arg0: i32) -> (i32, i32) {
    %c0_i32 = arith.constant 0 : i32
    %c0_i32_0 = arith.constant 0 : i32
    return %arg0, %c0_i32 : i32, i32
  }
  func.func @transform_1(%arg0: i32) -> (i32, i32) {
    %c0_i32 = arith.constant 0 : i32
    %c0_i32_0 = arith.constant 0 : i32
    %c0_i32_1 = arith.constant 0 : i32
    return %c0_i32, %c0_i32_0 : i32, i32
  }
  func.func @transform_2(%arg0: i32) -> (i32, i32) {
    %c0_i32 = arith.constant 0 : i32
    %c0_i32_0 = arith.constant 0 : i32
    %c0_i32_1 = arith.constant 0 : i32
    return %c0_i32, %c0_i32_0 : i32, i32
  }
  func.func @transform_3(%arg0: i32) -> (i32, i32) {
    %c0_i32 = arith.constant 0 : i32
    %c0_i32_0 = arith.constant 0 : i32
    %c0_i32_1 = arith.constant 0 : i32
    return %c0_i32, %c0_i32_0 : i32, i32
  }
  func.func @transform_4(%arg0: i32) -> (i32, i32) {
    %c0_i32 = arith.constant 0 : i32
    %c0_i32_0 = arith.constant 0 : i32
    %c0_i32_1 = arith.constant 0 : i32
    return %c0_i32, %c0_i32_0 : i32, i32
  }
  func.func @transform_5(%arg0: i32) -> (i32, i32) {
    %c0_i32 = arith.constant 0 : i32
    %c0_i32_0 = arith.constant 0 : i32
    %c0_i32_1 = arith.constant 0 : i32
    return %c0_i32, %c0_i32_0 : i32, i32
  }
  func.func @transform_6(%arg0: i32) -> (i32, i32) {
    %c0_i32 = arith.constant 0 : i32
    %c0_i32_0 = arith.constant 0 : i32
    %c0_i32_1 = arith.constant 0 : i32
    return %c0_i32, %c0_i32_0 : i32, i32
  }
  func.func @transform_7(%arg0: i32) -> (i32, i32) {
    %c0_i32 = arith.constant 0 : i32
    %c0_i32_0 = arith.constant 0 : i32
    return %arg0, %c0_i32 : i32, i32
  }
}

</mosaic_0001>

<bundles_post_ra>
// kernel: attention_forward.1
= control target key start
LH: loop header
LB: loop body
LE: loop exit
PB: predicated region body
PF: predicated region fallthrough
CT: control target
= control target key end

     0   :  { %s1008_s24 = smov 0   ;;  %s1175_s0 = inlined_call_operand.vmem [shape: f32[16,64], index: 0, kind: input, shape index: {}]   ;;  %s1176_s1 = inlined_call_operand.vmem [shape: f32[64,128], index: 1, kind: input, shape index: {}]   ;;  %s1177_s2 = inlined_call_operand.vmem [shape: f32[1,128], index: 2, kind: input, shape index: {}]   ;;  %s1178_s3 = inlined_call_operand.vmem [shape: f32[128,4], index: 3, kind: input, shape index: {}]   ;;  %s1179_s4 = inlined_call_operand.vmem [shape: f32[4,64], index: 4, kind: input, shape index: {}]   ;;  %s1180_s5 = inlined_call_operand.vmem [shape: f32[64,20], index: 5, kind: input, shape index: {}]   ;;  %s1181_s6 = inlined_call_operand.vmem [shape: f32[4,20], index: 6, kind: input, shape index: {}]   ;;  %s1182_s7 = inlined_call_operand.vmem [shape: f32[16,20], index: 7, kind: output, shape index: {}]  }
   0x1 LB: > { %s752_s25 = sadd.s32 4294967295, %s963_s24   ;;  %p756_p0 = scmp.ge.s32.totalorder %s963_s24, 1  ;;  %s963_s24 = sphi %s1008_s24, %s17_s24  }
   0x2   : > { %p236_p1 = scmp.lt.s32.totalorder %s963_s24, 3 }
   0x4   : > { %p237_p2 = pnand %p756_p0, %p236_p1 }
   0x5   : > { %v275_v0 = vld [vmem:[%s1176_s1] sm:$0xff] (!%p237_p2)  ;;  %v276_v1 = vld [vmem:[%s1176_s1 + $0x8] sm:$0xff] (!%p237_p2)  ;;  %v277_v2 = vld [vmem:[%s1176_s1 + $0x10] sm:$0xff] (!%p237_p2)  ;;  %v965_v3 = vmov (!%p237_p2), 0.0|0.0   ;;  %vm966_vm0 = vmmov (!%p237_p2), 0   ;;  %v967_v6 = vmov (!%p237_p2), 0.0  }
   0x6   : > { %240 = sbr.rel (%p237_p2) target bundleno = 1201 (0x4b1), region = 48  ;;  %890 = vmatprep.subr.bf16.mxu0 (!%p237_p2), %v965_v3  ;;  %v891_v4 = vpack.c.bf16 (!%p237_p2), %v276_v1, %v275_v0  ;;  %v278_v5 = vld [vmem:[%s1176_s1 + $0x18] sm:$0xff] (!%p237_p2)  ;;  %823 = vmatprep.mubr.msk.f32.mxu0 (!%p237_p2), %vm966_vm0, %v967_v6  ;;  %p266_p3 = scmp.lt.s32.totalorder (!%p237_p2), %s752_s25, 1  ;;  %v365_v7 = vld [vmem:[%s1178_s3] sm:$0xff] (!%p237_p2)  ;;  %v366_v9 = vld [vmem:[%s1178_s3 + $0x8] sm:$0xff] (!%p237_p2)  ;;  %vm290_vm1 = vcmask (!%p237_p2), 523264  }
   0x7   : > { %902 = vmatprep.subr.bf16.mxu1 (!%p237_p2), %v965_v3  ;;  %858 = vmatprep.mubr.msk.f32.mxu1 (!%p237_p2), %vm966_vm0, %v967_v6  ;;  %v894_v8 = vpack.c.bf16 (!%p237_p2), %v278_v5, %v277_v2  ;;  %v367_v10 = vld [vmem:[%s1178_s3 + $0x10] sm:$0xff] (!%p237_p2)  ;;  %v368_v11 = vld [vmem:[%s1178_s3 + $0x18] sm:$0xff] (!%p237_p2)  ;;  %v279_v12 = vld [vmem:[%s1176_s1 + $0x20] sm:$0xff] (!%p237_p2)  ;;  %v903_v14 = vpack.c.bf16 (!%p237_p2), %v366_v9, %v365_v7  ;;  %vm451_vm2 = vcmask (!%p237_p2), 31744   ;;  %vm467_vm3 = vcmask (!%p237_p2), 1043456  }
   0x8   : > { %892 = vmatpush3.bf16.msra.mxu0 (!%p237_p2), %v891_v4  ;;  %v280_v13 = vld [vmem:[%s1176_s1 + $0x28] sm:$0xff] (!%p237_p2)  ;;  %v906_v15 = vpack.c.bf16 (!%p237_p2), %v368_v11, %v367_v10  ;;  %v369_v17 = vld [vmem:[%s1178_s3 + $0x20] sm:$0xff] (!%p237_p2)  ;;  %v281_v19 = vld [vmem:[%s1176_s1 + $0x30] sm:$0xff] (!%p237_p2)  ;;  %vm697_vm4 = vcmask (!%p237_p2), 162816  }
   0x9   : > { %893 = vmatprep.subr.bf16.mxu0 (!%p237_p2), %v965_v3  ;;  %904 = vmatpush3.bf16.msra.mxu1 (!%p237_p2), %v903_v14  ;;  %v897_v16 = vpack.c.bf16 (!%p237_p2), %v280_v13, %v279_v12  ;;  %v370_v18 = vld [vmem:[%s1178_s3 + $0x28] sm:$0xff] (!%p237_p2)  ;;  %v282_v20 = vld [vmem:[%s1176_s1 + $0x38] sm:$0xff] (!%p237_p2)  ;;  %v371_v23 = vld [vmem:[%s1178_s3 + $0x30] sm:$0xff] (!%p237_p2) }
   0xa   : > { %905 = vmatprep.subr.bf16.mxu1 (!%p237_p2), %v965_v3  ;;  %v909_v21 = vpack.c.bf16 (!%p237_p2), %v370_v18, %v369_v17  ;;  %v900_v22 = vpack.c.bf16 (!%p237_p2), %v282_v20, %v281_v19  ;;  %v372_v24 = vld [vmem:[%s1178_s3 + $0x38] sm:$0xff] (!%p237_p2)  ;;  %v373_v27 = vld [vmem:[%s1178_s3 + $0x40] sm:$0xff] (!%p237_p2)  ;;  %v374_v28 = vld [vmem:[%s1178_s3 + $0x48] sm:$0xff] (!%p237_p2) }
   0xb   : > { %v912_v25 = vpack.c.bf16 (!%p237_p2), %v372_v24, %v371_v23  ;;  %v915_v29 = vpack.c.bf16 (!%p237_p2), %v374_v28, %v373_v27  ;;  %v375_v30 = vld [vmem:[%s1178_s3 + $0x50] sm:$0xff] (!%p237_p2)  ;;  %v376_v31 = vld [vmem:[%s1178_s3 + $0x58] sm:$0xff] (!%p237_p2)  ;;  %v377_v33 = vld [vmem:[%s1178_s3 + $0x60] sm:$0xff] (!%p237_p2) }
   0xc   : > { %895 = vmatpush3.bf16.msra.mxu0 (!%p237_p2), %v894_v8  ;;  %v918_v32 = vpack.c.bf16 (!%p237_p2), %v376_v31, %v375_v30  ;;  %v378_v34 = vld [vmem:[%s1178_s3 + $0x68] sm:$0xff] (!%p237_p2)  ;;  %v379_v36 = vld [vmem:[%s1178_s3 + $0x70] sm:$0xff] (!%p237_p2)  ;;  %v380_v37 = vld [vmem:[%s1178_s3 + $0x78] sm:$0xff] (!%p237_p2) }
   0xd   : > { %s1184_s25 = smov (!%p266_p3, %s752_s25), 1  ;;  %896 = vmatprep.subr.bf16.mxu0 %v965_v3  ;;  %907 = vmatpush3.bf16.msra.mxu1 %v906_v15  ;;  %v921_v35 = vpack.c.bf16 %v378_v34, %v377_v33  ;;  %v924_v38 = vpack.c.bf16 %v380_v37, %v379_v36  ;;  %v759_v39 = vld [vmem:[%s1177_s2] ss:$0 sm:$0xff]  ;;  %v543_v56 = vld [vmem:[%s1180_s5 + $0x8] sm:$0xff]  ;;  %v544_v60 = vld [vmem:[%s1180_s5 + $0x10] sm:$0xff] }
   0xe   : > { %s757_s10 = sshll.u32 %s1184_s25, 3  ;;  %908 = vmatprep.subr.bf16.mxu1 %v965_v3  ;;  %v463_v52 = vld [vmem:[%s1179_s4] sm:$0xf]  ;;  %v545_v61 = vld [vmem:[%s1180_s5 + $0x18] sm:$0xff]  ;;  %v547_v0 = vld [vmem:[%s1180_s5 + $0x28] sm:$0xff] }
   0xf   : > { %s269_s17 = scalar_lea.vmem %s1175_s0, %s757_s10  ;;  %v550_v53 = vld [vmem:[%s1181_s6] sm:$0xf]  ;;  %v930_v62 = vpack.c.bf16 %v545_v61, %v544_v60  ;;  %v548_v2 = vld [vmem:[%s1180_s5 + $0x30] sm:$0xff]  ;;  %v549_v4 = vld [vmem:[%s1180_s5 + $0x38] sm:$0xff]  ;;  %s273_s18 = scalar_lea.vmem %s1182_s7, %s757_s10 }
  0x10   : > { %898 = vmatpush3.bf16.msra.mxu0 %v897_v16  ;;  %v1083_v26 = vld [vmem:[%s269_s17] sm:$0xff]  ;;  %v936_v5 = vpack.c.bf16 %v549_v4, %v548_v2 }
  0x11   : > { %899 = vmatprep.subr.bf16.mxu0 %v965_v3  ;;  %910 = vmatpush3.bf16.msra.mxu1 %v909_v21  ;;  %v542_v55 = vld [vmem:[%s1180_s5] sm:$0xff] }
  0x12   : > { %911 = vmatprep.subr.bf16.mxu1 %v965_v3  ;;  %v927_v58 = vpack.c.bf16 %v543_v56, %v542_v55  ;;  %v546_v63 = vld [vmem:[%s1180_s5 + $0x20] sm:$0xff] }
  0x13   : > { %v933_v1 = vpack.c.bf16 %v547_v0, %v546_v63 }
  0x14   : > { %901 = vmatpush3.bf16.msra.mxu0 %v900_v22 }
  0x15   : > { %866 = vmatprep.subr.mxu0 %v967_v6  ;;  %913 = vmatpush3.bf16.msra.mxu1 %v912_v25 }
  0x16   : > { %914 = vmatprep.subr.bf16.mxu1 %v965_v3 }
  0x17   : > { %824 = vmatmul.mubr.msk.f32.vlgmr.msra.gmra.mrb[0].mxu0 %vm290_vm1, %v1083_v26 }
  0x18   : > { %868 = vmatprep.mubr.msk.f32.mxu0 %vm966_vm0, %v967_v6  ;;  %867 = vmatpush3.msk.msra.mxu0 %vm467_vm3, %v550_v53 }
  0x19   : > { %916 = vmatpush3.bf16.msra.mxu1 %v915_v29  ;;  %926 = vmatprep.subr.bf16.mxu0 %v965_v3 }
  0x1a   : > { %917 = vmatprep.subr.bf16.mxu1 %v965_v3 }
  0x1d   : > { %919 = vmatpush3.bf16.msra.mxu1 %v918_v32 }
  0x1e   : > { %920 = vmatprep.subr.bf16.mxu1 %v965_v3 }
  0x21   : > { %922 = vmatpush3.bf16.msra.mxu1 %v921_v35 }
  0x22   : > { %923 = vmatprep.subr.bf16.mxu1 %v965_v3 }
  0x25   : > { %925 = vmatpush3.bf16.msra.mxu1 %v924_v38 }
  0x26   : > { %861 = vmatprep.subr.mxu1 %v967_v6 }
  0xea   : > { %v360_v40 = vpop.f32.mrb[0].mxu0 }
  0xeb   : > { %v361_v41 = vadd.f32 %v759_v39, %v360_v40  ;;  %v825_v42 = vpop.f32.mrb[1].mxu0 }
  0xed   : > { %951 = vtanh.f32 %v361_v41 }
  0xf7   : > { %v952_v43 = vpop.eup %951 }
  0xf8   : > { %859 = vmatmul.mubr.f32.vlgmr.msra.gmra.mrb[0].mxu1 %v952_v43 }
  0xf9   : > { %863 = vmatprep.mubr.msk.f32.mxu1 %vm966_vm0, %v967_v6  ;;  %862 = vmatpush3.msk.msra.mxu1 %vm467_vm3, %v463_v52 }
 0x1cb   : > { %v447_v44 = vpop.f32.mrb[0].mxu1 }
 0x1cc   : > { %v860_v45 = vpop.f32.mrb[1].mxu1  ;;  %v452_v46 = vsel %vm451_vm2, %v447_v44, -inf }
 0x1cd   : > { %453 = vmax.xlane.f32.xlu0 %v452_v46 }
 0x25a   : > { %v454_v47 = vpop.xlane.xlu0 %453 }
 0x25b   : > { %v455_v48 = vsub.f32 %v447_v44, %v454_v47 }
 0x25d   : > { %v456_v49 = vmul.f32 1.442695, %v455_v48 }
 0x25f   : > { %953 = vpow2.f32 %v456_v49 }
 0x269   : > { %v954_v50 = vpop.eup %953 }
 0x26a   : > { %v458_v51 = vsel %vm451_vm2, %v954_v50, 0.0 }
 0x26b   : > { %459 = vadd.xlane.f32.xlu0 %v458_v51 }
 0x2f8   : > { %v460_v54 = vpop.xlane.xlu0 %459 }
 0x2f9   : > { %955 = vrcp.f32 %v460_v54 }
 0x303   : > { %v956_v57 = vpop.eup %955 }
 0x304   : > { %v462_v59 = vmul.f32 %v956_v57, %v954_v50 }
 0x306   : > { %864 = vmatmul.mubr.msk.f32.vlgmr.msra.gmra.mrb[2].mxu1 %vm451_vm2, %v462_v59  ;;  %869 = vmatmul.mubr.msk.f32.vlgmr.msra.gmra.mrb[2].mxu0 %vm451_vm2, %v462_v59 }
 0x307   : > { %928 = vmatpush3.bf16.msra.mxu0 %v927_v58  ;;  %887 = vmatprep.mubr.msk.f32.mxu0 %vm966_vm0, %v967_v6 }
 0x308   : > { %929 = vmatprep.subr.bf16.mxu0 %v965_v3 }
 0x30b   : > { %931 = vmatpush3.bf16.msra.mxu0 %v930_v62 }
 0x30c   : > { %932 = vmatprep.subr.bf16.mxu0 %v965_v3 }
 0x30f   : > { %934 = vmatpush3.bf16.msra.mxu0 %v933_v1 }
 0x310   : > { %935 = vmatprep.subr.bf16.mxu0 %v965_v3 }
 0x313   : > { %937 = vmatpush3.bf16.msra.mxu0 %v936_v5 }
 0x3d9   : > { %v537_v6 = vpop.f32.mrb[2].mxu1 }
 0x3da   : > { %v541_v7 = vmul.f32 %v537_v6, %v1083_v26  ;;  %v865_v8 = vpop.f32.mrb[3].mxu1 }
 0x3dc   : > { %888 = vmatmul.mubr.msk.f32.vlgmr.msra.gmra.mrb[2].mxu0 %vm290_vm1, %v541_v7 }
 0x4af   : > { %v693_v3 = vpop.f32.mrb[2].mxu0 }
 0x4b0   : > { %698 = vst.msk [vmem:[%s273_s18] sm:$0xff] %vm697_vm4, %v693_v3  ;;  %v889_v9 = vpop.f32.mrb[3].mxu0 }
 0x4b1 PF: > { %s17_s24 = sadd.s32 1, %s963_s24  }
 0x4b2   : > { %p14_p4 = scmp.ge.s32.totalorder %s17_s24, 4  }
 0x4b4   :  { %16 = sbr.rel (!%p14_p4) target bundleno = 1 (0x1), region = 78 }

</bundles_post_ra>
